<compile_context>
chip_gen: v7x
topology: tpu7x:2x2x1
jax: 0.10.0
libtpu: 0.0.40
codegen_flags: <defaults>
</compile_context>

<pallas_src>
import functools

import jax
import jax.numpy as jnp
from jax.experimental import pallas as pl
from jax.experimental.pallas import tpu as pltpu


def _img_emb_kernel_masked(patches_ref, w_ref, pos_ref, mask_ref, mask_tok_ref, out_ref):
    # patches_ref : (nb, S, Cpp) bf16 ; S = Np+1, row 0 of every image is all-zero (CLS slot)
    # w_ref       : (Cpp, H)     bf16   projection matrix
    # pos_ref     : (S, H)       f32    row 0 = cls_token + pos[0]; rows 1: = pos[1:] + conv bias
    # mask_ref    : (nb, S, 1)   f32    row 0 = 0
    # mask_tok_ref: (1, H)       f32    mask_token - conv bias (keeps the bias fold exact)
    # out_ref     : (nb, S, H)
    nb = patches_ref.shape[0]
    pos = pos_ref[...]
    mtok = mask_tok_ref[...]
    for i in range(nb):  # static unroll: one aligned MXU matmul + one aligned slab store per image
        proj = jnp.dot(patches_ref[i], w_ref[...], preferred_element_type=jnp.float32)
        proj = proj + mask_ref[i] * (mtok - proj)            # fused linear mask blend
        out_ref[i] = (proj + pos).astype(out_ref.dtype)


def _img_emb_kernel_unmasked(patches_ref, w_ref, pos_ref, out_ref):
    nb = patches_ref.shape[0]
    pos = pos_ref[...]
    for i in range(nb):
        proj = jnp.dot(patches_ref[i], w_ref[...], preferred_element_type=jnp.float32)
        out_ref[i] = (proj + pos).astype(out_ref.dtype)


def _round_up(x, m):
    return -(-x // m) * m


def _vmem_budget_bytes():
    # ~75% of the physical per-core VMEM (v5e/v6e: 128 MiB -> 96 MiB; v7x: 64 MiB -> 48 MiB).
    try:
        cap = int(pltpu.get_tpu_info().vmem_capacity_bytes)
    except Exception:  # interpret mode / old runtime: assume the smallest (v7x) core
        cap = 64 << 20
    return int(min((cap * 3) // 4, 96 << 20))


def _block_footprint_bytes(nb, seq, cpp, hidden, out_itemsize, masked):
    """Sublane/lane-padded VMEM footprint of one grid step (all blocks double-buffered)."""
    cpp_l = _round_up(cpp, 128)
    hid_l = _round_up(hidden, 128)
    seq_bf16 = _round_up(seq, 16)
    seq_f32 = _round_up(seq, 8)
    seq_out = _round_up(seq, 16 if out_itemsize == 2 else 8)
    varying = (nb * seq_bf16 * cpp_l * 2                     # patches block (bf16)
               + nb * seq_out * hid_l * out_itemsize)        # output block
    if masked:
        varying += nb * seq_f32 * 128 * 4                    # mask block ((...,1) pads to 128 lanes)
    const = (_round_up(cpp, 16) * hid_l * 2                  # projection weight (bf16)
             + seq_f32 * hid_l * 4)                          # fused cls/pos/bias table (f32)
    if masked:
        const += 8 * hid_l * 4                               # adjusted mask token
    return 2 * (varying + const)


def _pick_images_per_step(B, seq, cpp, hidden, out_itemsize, masked, budget):
    """Images per grid step: amortize the ~0.35us/step pipeline overhead and feed the MXU
    more rows (target M >= 512) while fitting the per-device VMEM budget and keeping
    at least 2 grid steps so the 'parallel' batch axis can still shard across cores."""
    target_m = 512
    nb = 1
    for d in range(1, B + 1):
        if B % d:
            continue
        if d > 1 and B // d < 2:
            break
        if _block_footprint_bytes(d, seq, cpp, hidden, out_itemsize, masked) + (2 << 20) > budget:
            break
        nb = d
        if d * seq >= target_m:
            break
    return nb


@functools.partial(jax.jit, static_argnames=("patch_size", "out_dtype"))
def image_embeddings_forward(pixel_values, image_patches_mask, params, patch_size,
                             out_dtype=jnp.float32):
    """pixel_values: (B, C, H, W) NCHW.  image_patches_mask: (B, Np) or None.
    Returns (B, Np + 1, hidden); dropout is identity (eval / p=0.0)."""
    B, C, H, W = pixel_values.shape
    P = patch_size
    hP, wP = H // P, W // P
    Np = hP * wP
    S = Np + 1
    Cpp = C * P * P
    hidden = params["proj_w"].shape[0]
    masked = image_patches_mask is not None
    out_itemsize = jnp.dtype(out_dtype).itemsize

    # --- glue: patchify (Conv2d(kernel=stride=P) as a matmul) + one zero CLS row per image.
    # TODO(synk): fuse this NCHW->(B, S, Cpp) relayout into the kernel to drop an HBM pass.
    patches = pixel_values.reshape(B, C, hP, P, wP, P)
    patches = patches.transpose(0, 2, 4, 1, 3, 5).reshape(B, Np, Cpp)
    patches = jnp.pad(patches.astype(jnp.bfloat16), ((0, 0), (1, 0), (0, 0)))   # (B, S, Cpp)

    # Conv weight (E, C, P, P) -> projection matrix (Cpp, E), bf16 for the MXU.
    w_mat = params["proj_w"].reshape(hidden, Cpp).T.astype(jnp.bfloat16)
    b_vec = params["proj_b"].reshape(1, hidden).astype(jnp.float32)
    pos = params["position_embeddings"].reshape(S, hidden).astype(jnp.float32)
    cls = params["cls_token"].reshape(1, hidden).astype(jnp.float32)
    # Single position table: row 0 carries cls_token + pos[0] (the zero patch row contributes
    # nothing), rows 1: carry pos[1:] + conv bias (bias folded out of the matmul).
    pos_full = jnp.concatenate([cls + pos[0:1], pos[1:] + b_vec], axis=0)         # (S, H)
    # mask_token adjusted so the fold stays exact under the linear blend:
    #   (conv+b)*(1-w) + mtok*w + pos  ==  conv + w*((mtok-b) - conv) + (pos + b)
    mask_tok = params["mask_token"].reshape(1, hidden).astype(jnp.float32) - b_vec

    budget = _vmem_budget_bytes()
    nb = _pick_images_per_step(B, S, Cpp, hidden, out_itemsize, masked, budget)
    vmem_limit = int(min(max(
        _block_footprint_bytes(nb, S, Cpp, hidden, out_itemsize, masked) + (2 << 20),
        32 << 20), budget))

    common_specs = [
        pl.BlockSpec((nb, S, Cpp), lambda b: (b, 0, 0)),    # patches (nb images per step)
        pl.BlockSpec((Cpp, hidden), lambda b: (0, 0)),      # projection weight (grid-invariant)
        pl.BlockSpec((S, hidden), lambda b: (0, 0)),        # fused cls / pos / bias table
    ]
    out_spec = pl.BlockSpec((nb, S, hidden), lambda b: (b, 0, 0))
    compiler_params = pltpu.CompilerParams(
        dimension_semantics=("parallel",),
        vmem_limit_bytes=vmem_limit,
    )
    out_shape = jax.ShapeDtypeStruct((B, S, hidden), out_dtype)
    grid = (B // nb,)

    if not masked:
        return pl.pallas_call(
            _img_emb_kernel_unmasked,
            out_shape=out_shape,
            grid_spec=pltpu.PrefetchScalarGridSpec(
                num_scalar_prefetch=0, grid=grid,
                in_specs=common_specs, out_specs=out_spec),
            compiler_params=compiler_params,
        )(patches, w_mat, pos_full)

    mask = image_patches_mask.astype(jnp.float32).reshape(B, Np)
    mask = jnp.pad(mask, ((0, 0), (1, 0))).reshape(B, S, 1)       # CLS row of the mask -> 0
    return pl.pallas_call(
        _img_emb_kernel_masked,
        out_shape=out_shape,
        grid_spec=pltpu.PrefetchScalarGridSpec(
            num_scalar_prefetch=0, grid=grid,
            in_specs=common_specs + [
                pl.BlockSpec((nb, S, 1), lambda b: (b, 0, 0)),    # mask (per-image)
                pl.BlockSpec((1, hidden), lambda b: (0, 0)),      # adjusted mask token
            ],
            out_specs=out_spec),
        compiler_params=compiler_params,
    )(patches, w_mat, pos_full, mask, mask_tok)


def _reference(pixel_values, image_patches_mask, params, patch_size):
    """Pure-JAX (f32) reference mirroring the PyTorch forward semantics."""
    B, C, H, W = pixel_values.shape
    P = patch_size
    hidden = params["proj_w"].shape[0]
    out = jax.lax.conv_general_dilated(
        pixel_values, params["proj_w"], window_strides=(P, P), padding="VALID",
        dimension_numbers=("NCHW", "OIHW", "NCHW"))
    out = out + params["proj_b"].reshape(1, hidden, 1, 1)
    emb = out.reshape(B, hidden, -1).transpose(0, 2, 1)        # (B, Np, hidden)
    if image_patches_mask is not None:
        w = image_patches_mask.astype(jnp.float32)[..., None]
        emb = emb * (1.0 - w) + params["mask_token"].reshape(1, 1, hidden) * w
    cls = jnp.broadcast_to(params["cls_token"].reshape(1, 1, hidden), (B, 1, hidden))
    emb = jnp.concatenate([cls, emb], axis=1)
    emb = emb + params["position_embeddings"]
    return emb


if __name__ == "__main__":
    # Small shapes consistent with the module: image 16x16, patch 4, 4 channels, hidden 32.
    B, C, IMG, P, HID = 2, 4, 16, 4, 32
    Np = (IMG // P) * (IMG // P)

    key = jax.random.PRNGKey(0)
    k = jax.random.split(key, 7)
    params = {
        # nn.Conv2d(C, HID, kernel_size=P, stride=P) weight/bias
        "proj_w": jax.random.normal(k[0], (HID, C, P, P), jnp.float32) * 0.05,
        "proj_b": jax.random.normal(k[1], (HID,), jnp.float32) * 0.05,
        # Parameters (zeros in the checkpointed init; deterministic non-zero here)
        "cls_token": jax.random.normal(k[2], (1, 1, HID), jnp.float32) * 0.02,
        "position_embeddings": jax.random.normal(k[3], (1, Np + 1, HID), jnp.float32) * 0.02,
        "mask_token": jax.random.normal(k[4], (1, 1, HID), jnp.float32) * 0.02,
    }

    pixel_values = jax.random.normal(k[5], (B, C, IMG, IMG), jnp.float32)
    image_patches_mask = (jax.random.uniform(k[6], (B, Np)) > 0.5).astype(jnp.float32)

    out_masked = jax.block_until_ready(
        image_embeddings_forward(pixel_values, image_patches_mask, params, patch_size=P))
    out_unmasked = jax.block_until_ready(
        image_embeddings_forward(pixel_values, None, params, patch_size=P))

    ref_masked = _reference(pixel_values, image_patches_mask, params, P)
    ref_unmasked = _reference(pixel_values, None, params, P)

    assert out_masked.shape == (B, Np + 1, HID)
    assert out_unmasked.shape == (B, Np + 1, HID)
    # bf16 matmul inputs -> loosened tolerance vs. the f32 reference.
    assert jnp.allclose(out_masked, ref_masked, atol=2e-2, rtol=2e-2), "masked mismatch"
    assert jnp.allclose(out_unmasked, ref_unmasked, atol=2e-2, rtol=2e-2), "unmasked mismatch"

    print("KERNEL_OK")
</pallas_src>

<mosaic_0001>
module attributes {stable_mosaic.version = 11 : i64} {
  func.func @_img_emb_kernel_masked(%arg0: i32, %arg1: memref<1x17x64xbf16, #tpu.memory_space<vmem>>, %arg2: memref<64x32xbf16, #tpu.memory_space<vmem>>, %arg3: memref<17x32xf32, #tpu.memory_space<vmem>>, %arg4: memref<1x17x1xf32, #tpu.memory_space<vmem>>, %arg5: memref<1x32xf32, #tpu.memory_space<vmem>>, %arg6: memref<1x17x32xf32, #tpu.memory_space<vmem>>) attributes {dimension_semantics = [#tpu.dimension_semantics<parallel>], iteration_bounds = array<i64: 2>, scalar_prefetch = 0 : i64, scratch_operands = 0 : i64, tpu.core_type = #tpu.core_type<tc>, window_params = [{transform_indices = @transform_0, window_bounds = array<i64: 1, 17, 64>}, {pipeline_mode = #tpu.pipeline_mode<synchronous>, transform_indices = @transform_1, window_bounds = array<i64: 64, 32>}, {pipeline_mode = #tpu.pipeline_mode<synchronous>, transform_indices = @transform_2, window_bounds = array<i64: 17, 32>}, {transform_indices = @transform_3, window_bounds = array<i64: 1, 17, 1>}, {pipeline_mode = #tpu.pipeline_mode<synchronous>, transform_indices = @transform_4, window_bounds = array<i64: 1, 32>}, {transform_indices = @transform_5, window_bounds = array<i64: 1, 17, 32>}]} {
    %c0 = arith.constant 0 : index
    %c0_0 = arith.constant 0 : index
    %0 = vector.load %arg3[%c0, %c0_0] : memref<17x32xf32, #tpu.memory_space<vmem>>, vector<17x32xf32>
    %c0_1 = arith.constant 0 : index
    %c0_2 = arith.constant 0 : index
    %1 = vector.load %arg5[%c0_1, %c0_2] : memref<1x32xf32, #tpu.memory_space<vmem>>, vector<1x32xf32>
    %c0_3 = arith.constant 0 : index
    %c0_4 = arith.constant 0 : index
    %c0_5 = arith.constant 0 : index
    %2 = vector.load %arg1[%c0_3, %c0_4, %c0_5] : memref<1x17x64xbf16, #tpu.memory_space<vmem>>, vector<1x17x64xbf16>
    %3 = vector.shape_cast %2 : vector<1x17x64xbf16> to vector<17x64xbf16>
    %c0_6 = arith.constant 0 : index
    %c0_7 = arith.constant 0 : index
    %4 = vector.load %arg2[%c0_6, %c0_7] : memref<64x32xbf16, #tpu.memory_space<vmem>>, vector<64x32xbf16>
    %cst = arith.constant dense<0.000000e+00> : vector<17x32xf32>
    %5 = tpu.matmul %3, %4, %cst {dimension_numbers = #tpu.dot_dimension_numbers<[1], [0], [0], [1], [0, 0, 1, 1], [], []>} : vector<17x64xbf16>, vector<64x32xbf16>, vector<17x32xf32> -> vector<17x32xf32>
    %c0_8 = arith.constant 0 : index
    %c0_9 = arith.constant 0 : index
    %c0_10 = arith.constant 0 : index
    %6 = vector.load %arg4[%c0_8, %c0_9, %c0_10] : memref<1x17x1xf32, #tpu.memory_space<vmem>>, vector<1x17x1xf32>
    %7 = vector.shape_cast %6 : vector<1x17x1xf32> to vector<17x1xf32>
    %8 = vector.broadcast %1 : vector<1x32xf32> to vector<17x32xf32>
    %9 = arith.subf %8, %5 : vector<17x32xf32>
    %10 = vector.broadcast %7 : vector<17x1xf32> to vector<17x32xf32>
    %11 = arith.mulf %10, %9 : vector<17x32xf32>
    %12 = arith.addf %5, %11 : vector<17x32xf32>
    %13 = arith.addf %12, %0 : vector<17x32xf32>
    %c0_11 = arith.constant 0 : index
    %c0_12 = arith.constant 0 : index
    %c0_13 = arith.constant 0 : index
    %14 = vector.load %arg6[%c0_11, %c0_12, %c0_13] : memref<1x17x32xf32, #tpu.memory_space<vmem>>, vector<1x17x32xf32>
    %15 = vector.shape_cast %14 : vector<1x17x32xf32> to vector<17x32xf32>
    %16 = vector.shape_cast %13 : vector<17x32xf32> to vector<1x17x32xf32>
    tpu.vector_store %arg6[%c0_11, %c0_12, %c0_13], %16 {strides = array<i32>} : memref<1x17x32xf32, #tpu.memory_space<vmem>>, vector<1x17x32xf32>,
    return
  }
  func.func @transform_0(%arg0: i32) -> (i32, i32, i32) {
    %c0_i32 = arith.constant 0 : i32
    %c0_i32_0 = arith.constant 0 : i32
    %c0_i32_1 = arith.constant 0 : i32
    return %arg0, %c0_i32, %c0_i32_0 : i32, i32, i32
  }
  func.func @transform_1(%arg0: i32) -> (i32, i32) {
    %c0_i32 = arith.constant 0 : i32
    %c0_i32_0 = arith.constant 0 : i32
    %c0_i32_1 = arith.constant 0 : i32
    return %c0_i32, %c0_i32_0 : i32, i32
  }
  func.func @transform_2(%arg0: i32) -> (i32, i32) {
    %c0_i32 = arith.constant 0 : i32
    %c0_i32_0 = arith.constant 0 : i32
    %c0_i32_1 = arith.constant 0 : i32
    return %c0_i32, %c0_i32_0 : i32, i32
  }
  func.func @transform_3(%arg0: i32) -> (i32, i32, i32) {
    %c0_i32 = arith.constant 0 : i32
    %c0_i32_0 = arith.constant 0 : i32
    %c0_i32_1 = arith.constant 0 : i32
    return %arg0, %c0_i32, %c0_i32_0 : i32, i32, i32
  }
  func.func @transform_4(%arg0: i32) -> (i32, i32) {
    %c0_i32 = arith.constant 0 : i32
    %c0_i32_0 = arith.constant 0 : i32
    %c0_i32_1 = arith.constant 0 : i32
    return %c0_i32, %c0_i32_0 : i32, i32
  }
  func.func @transform_5(%arg0: i32) -> (i32, i32, i32) {
    %c0_i32 = arith.constant 0 : i32
    %c0_i32_0 = arith.constant 0 : i32
    %c0_i32_1 = arith.constant 0 : i32
    return %arg0, %c0_i32, %c0_i32_0 : i32, i32, i32
  }
}

</mosaic_0001>

<bundles_post_ra>
// kernel: image_embeddings_forward.1
= control target key start
LH: loop header
LB: loop body
LE: loop exit
PB: predicated region body
PF: predicated region fallthrough
CT: control target
= control target key end

     0   :  { %s551_s18 = smov 0   ;;  %s605_s0 = inlined_call_operand.vmem [shape: bf16[2,17,64], index: 0, kind: input, shape index: {}]   ;;  %s606_s1 = inlined_call_operand.vmem [shape: bf16[64,32], index: 1, kind: input, shape index: {}]   ;;  %s607_s2 = inlined_call_operand.vmem [shape: f32[17,32], index: 2, kind: input, shape index: {}]   ;;  %s608_s3 = inlined_call_operand.vmem [shape: f32[2,17,1], index: 3, kind: input, shape index: {}]   ;;  %s609_s4 = inlined_call_operand.vmem [shape: f32[1,32], index: 4, kind: input, shape index: {}]   ;;  %s610_s5 = inlined_call_operand.vmem [shape: f32[2,17,32], index: 5, kind: output, shape index: {}]  }
   0x1 LB: > { %s456_s19 = sadd.s32 4294967295, %s518_s18   ;;  %p460_p0 = scmp.ge.s32.totalorder %s518_s18, 1  ;;  %s518_s18 = sphi %s551_s18, %s15_s18  }
   0x2   : > { %p197_p1 = scmp.lt.s32.totalorder %s518_s18, 3 }
   0x4   : > { %p198_p2 = pnand %p460_p0, %p197_p1 }
   0x5   : > { %v506_v0 = vld [vmem:[%s606_s1] sm:$0xff] (!%p198_p2)   ;;  %p230_p3 = scmp.lt.s32.totalorder (!%p198_p2), %s456_s19, 1  ;;  %v507_v1 = vld [vmem:[%s606_s1 + $0x8] sm:$0xff] (!%p198_p2)   ;;  %v508_v2 = vld [vmem:[%s606_s1 + $0x10] sm:$0xff] (!%p198_p2)   ;;  %v520_v3 = vmov (!%p198_p2), 0   ;;  %vm293_vm0 = vcmask (!%p198_p2), 523264  }
   0x6   : > { %201 = sbr.rel (%p198_p2) target bundleno = 247 (0xf7), region = 40  ;;  %481 = vmatprep.subr.bf16.mxu0 (!%p198_p2), %v506_v0  ;;  %504 = vset.pattern.permute.xlu0 (!%p198_p2), %v520_v3  ;;  %v509_v4 = vld [vmem:[%s606_s1 + $0x18] sm:$0xff] (!%p198_p2)   ;;  %v472_v10 = vld [vmem:[%s609_s4] ss:$0 sm:$0xff] (!%p198_p2)  ;;  %v248_v21 = vld [vmem:[%s607_s2 + $0x10] sm:$0x1] (!%p198_p2) }
   0x7   : > { %482 = vmatpush3.bf16.msra.mxu0 (!%p198_p2), %v506_v0  ;;  %505 = vset.pattern.permute.xlu1 (!%p198_p2), %v520_v3  ;;  %v246_v24 = vld [vmem:[%s607_s2] sm:$0xff] (!%p198_p2)  ;;  %vm387_vm1 = vcmask (!%p198_p2), 253952   ;;  %vm384_vm2 = vcmask (!%p198_p2), 261120   ;;  %v247_v29 = vld [vmem:[%s607_s2 + $0x8] sm:$0xff] (!%p198_p2) }
   0x8   : > { %483 = vmatprep.subr.bf16.mxu0 (!%p198_p2), %v507_v1 }
   0xb   : > { %484 = vmatpush3.bf16.msra.mxu0 (!%p198_p2), %v507_v1 }
   0xc   : > { %485 = vmatprep.subr.bf16.mxu0 (!%p198_p2), %v508_v2 }
   0xd   : > { %s612_s19 = smov (!%p230_p3, %s456_s19), 1 }
   0xe   : > { %s493_s26 = smul.u32 12, %s612_s19 }
   0xf   : > { %s494_s27 = smul.u32 24, %s612_s19  ;;  %486 = vmatpush3.bf16.msra.mxu0 %v508_v2 }
  0x10   : > { %s234_s30 = scalar_lea.vmem %s605_s0, %s493_s26  ;;  %487 = vmatprep.subr.bf16.mxu0 %v509_v4 }
  0x11   : > { %s239_s8 = scalar_lea.vmem %s608_s3, %s494_s27  ;;  %v510_v5 = vld [vmem:[%s234_s30] sm:$0xff]   ;;  %v511_v9 = vld [vmem:[%s234_s30 + $0x8] ss:$0 sps:$4 sm:$0x11]   ;;  %s244_s21 = scalar_lea.vmem %s610_s5, %s494_s27 }
  0x12   : > { %v348_v6 = vld [vmem:[%s239_s8] sm:$0xff]  ;;  %v350_v7 = vld [vmem:[%s239_s8 + $0x10] sm:$0x1]  ;;  %489 = vmatprep.mubr.msk.bf16.mxu0 %vm293_vm0, %v510_v5  ;;  %v349_v8 = vld [vmem:[%s239_s8 + $0x8] sm:$0xff] }
  0x13   : > { %362 = vperm.xlu0 %504, %v348_v6   ;;  %372 = vperm.xlu1 %505, %v350_v7  }
  0x14   : > { %488 = vmatpush3.bf16.msra.mxu0 %v509_v4 }
  0x17   : > { %367 = vperm.xlu0 %504, %v349_v8   ;;  %490 = vmatmul.mubr.msk.bf16.vlgmr.msra.gmra.mrb[0].mxu0 %vm293_vm0, %v511_v9 }
  0x92   : > { %v363_v11 = vpop.permute.xlu0 %362  ;;  %v373_v13 = vpop.permute.xlu1 %372 }
  0x96   : > { %v368_v23 = vpop.permute.xlu0 %367 }
  0xea   : > { %v491_v12 = vpop.f32.mrb[0].mxu0 }
  0xeb   : > { %v359_v14 = vsub.f32 %v472_v10, %v491_v12  ;;  %v334_v15 = vpop.f32.mrb[1].mxu0 }
  0xec   : > { %v357_v16 = vsub.f32 %v472_v10, %v334_v15  ;;  %v492_v17 = vpop.f32.mrb[2].mxu0 }
  0xed   : > { %v377_v18 = vmul.f32 %v373_v13, %v359_v14  ;;  %v337_v19 = vpop.f32.mrb[3].mxu0 }
  0xee   : > { %v375_v20 = vmul.f32 %v363_v11, %v357_v16  ;;  %v358_v22 = vsub.f32 %v472_v10, %v337_v19 }
  0xef   : > { %v380_v25 = vadd.f32 %v491_v12, %v377_v18 }
  0xf0   : > { %v378_v26 = vadd.f32 %v375_v20, %v334_v15  ;;  %v376_v27 = vmul.f32 %v368_v23, %v358_v22 }
  0xf1   : > { %v383_v28 = vadd.f32 %v380_v25, %v248_v21 }
  0xf2   : > { %v381_v30 = vadd.f32 %v378_v26, %v246_v24  ;;  %v379_v31 = vadd.f32 %v376_v27, %v337_v19 }
  0xf3   : > { %388 = vst.msk [vmem:[%s244_s21 + $0x10] sm:$0x1] %vm387_vm1, %v383_v28 }
  0xf4   : > { %385 = vst.msk [vmem:[%s244_s21] sm:$0xff] %vm384_vm2, %v381_v30  ;;  %v382_v32 = vadd.f32 %v379_v31, %v247_v29 }
  0xf6   : > { %386 = vst.msk [vmem:[%s244_s21 + $0x8] sm:$0xff] %vm384_vm2, %v382_v32 }
  0xf7 PF: > { %s15_s18 = sadd.s32 1, %s518_s18  }
  0xf8   : > { %p12_p4 = scmp.ge.s32.totalorder %s15_s18, 4  }
  0xfa   :  { %14 = sbr.rel (!%p12_p4) target bundleno = 1 (0x1), region = 73 }

</bundles_post_ra>
